<compile_context>
chip_gen: v7x
topology: tpu7x:2x2x1
jax: 0.10.0
libtpu: 0.0.40
codegen_flags: <defaults>
</compile_context>

<pallas_src>
import jax
import jax.numpy as jnp
from jax.experimental import pallas as pl
from jax.experimental.pallas import tpu as pltpu


def _round_up8(x: int) -> int:
    return ((x + 7) // 8) * 8


def _vmem_capacity_bytes() -> int:
    """Physical VMEM capacity of the current generation; fall back to the
    tightest case (v7x: 64 MiB per TensorCore) if the query is unavailable."""
    try:
        cap = int(pltpu.get_tpu_info().vmem_capacity_bytes)
        if cap > 0:
            return cap
    except Exception:
        pass
    return 64 * 1024 * 1024


def _choose_tile_b(batch: int, n_classes: int, in_itemsize: int,
                   vmem_budget_bytes: int) -> int:
    """Bytes-based batch-tile selection.

    Budgets per row of a grid step:
      * 2 inputs x 2 pipeline buffers (input dtype)
      * ~4 full-width f32 temporaries (upcast inputs / exp / diff / contrib)
    and additionally guarantees >=2 (preferably >=4) grid steps when B permits,
    so v7x megacore sharding and DMA/compute overlap are active.
    """
    per_row = 4 * n_classes * in_itemsize + 4 * n_classes * 4
    tile = max(8, vmem_budget_bytes // max(per_row, 1))
    tile = min(tile, 4096)  # bound per-step latency; 4096 rows >> per-step overhead

    if batch > 8:
        # Prefer 4 grid steps when each step still moves >= ~1 MiB of inputs,
        # otherwise settle for 2 steps.
        step_row_bytes = 2 * n_classes * in_itemsize
        rows_1mib = max(8, (1 << 20) // max(step_row_bytes, 1))
        tile_4 = _round_up8(-(-batch // 4))
        tile_2 = _round_up8(-(-batch // 2))
        tile = min(tile, tile_4 if tile_4 >= rows_1mib else tile_2)

    tile = min(tile, _round_up8(batch))
    return max(8, (tile // 8) * 8)


def _make_symkl_kernel(batch: int, tile_b: int, mask_last: bool):
    def kernel(ps_ref, pw_ref, out_ref):
        # (tile_b, C) tiles; compute in f32 regardless of input dtype
        # (bf16 logits stay bf16 in HBM, halving DMA bytes; cast happens here).
        ps = ps_ref[...].astype(jnp.float32)
        pw = pw_ref[...].astype(jnp.float32)

        # Numerically stable shifted logits (class axis == last / lane axis).
        ps_shift = ps - jnp.max(ps, axis=1, keepdims=True)
        pw_shift = pw - jnp.max(pw, axis=1, keepdims=True)

        # One EUP exp pass per input, reused for softmax AND log-softmax.
        es = jnp.exp(ps_shift)
        ew = jnp.exp(pw_shift)
        sum_es = jnp.sum(es, axis=1, keepdims=True)   # (tile_b, 1)
        sum_ew = jnp.sum(ew, axis=1, keepdims=True)   # (tile_b, 1)

        # Exact normalization (rows sum to 1; no approx reciprocal).
        sm_s = es / sum_es                            # softmax(p_s)
        sm_w = ew / sum_ew                            # softmax(p_w)

        # Folded log-softmax difference:
        #   log_softmax(p_w) - log_softmax(p_s)
        #     = (pw_shift - ps_shift) + (log(sum_es) - log(sum_ew))
        diff_logp = (pw_shift - ps_shift) + jnp.log(sum_es / sum_ew)

        contrib = (sm_w - sm_s) * diff_logp           # (tile_b, C), >= 0

        if mask_last:
            # Ragged last tile: rows >= batch hold undefined block padding;
            # zero their contribution before the reduction so junk (even
            # NaN/Inf) cannot leak into the loss.
            row = (pl.program_id(0) * tile_b
                   + jax.lax.broadcasted_iota(jnp.int32, contrib.shape, 0))
            contrib = jnp.where(row < batch, contrib, 0.0)

        # Full per-tile reduction to a scalar; written to a (1,1) SMEM block
        # (avoids lane-width-1 masked VMEM stores + near-empty writebacks).
        out_ref[0, 0] = jnp.sum(contrib)

    return kernel


def symmetric_kl(p_s: jax.Array, p_w: jax.Array) -> jax.Array:
    """Symmetric KL distillation loss.

    p_s, p_w: (B, C) logits (f32 or bf16 -- pass bf16 directly if the producer
    can emit it; the kernel upcasts internally). Returns a scalar f32.
    """
    assert p_s.shape == p_w.shape and p_s.ndim == 2
    B, C = p_s.shape
    itemsize = jnp.dtype(p_s.dtype).itemsize

    vmem_cap = _vmem_capacity_bytes()
    # ~42 MiB working-set budget on v7x (64 MiB/TC), up to 64 MiB on v5e/v6e.
    vmem_budget = min((2 * vmem_cap) // 3, 64 * 1024 * 1024)
    tile_b = _choose_tile_b(B, C, itemsize, vmem_budget)
    num_tiles = -(-B // tile_b)
    mask_last = (B % tile_b) != 0

    # TODO(synk): for vocab-scale C (where even an 8-row tile + f32 temps
    # approaches v7x's 64 MiB/TC VMEM) add a second "arbitrary" grid axis over
    # C with a two-pass / online log-softmax.
    partials = pl.pallas_call(
        _make_symkl_kernel(B, tile_b, mask_last),
        out_shape=jax.ShapeDtypeStruct((num_tiles, 1), jnp.float32),
        grid_spec=pltpu.PrefetchScalarGridSpec(
            num_scalar_prefetch=0,
            grid=(num_tiles,),
            in_specs=[
                pl.BlockSpec((tile_b, C), lambda i: (i, 0)),
                pl.BlockSpec((tile_b, C), lambda i: (i, 0)),
            ],
            out_specs=pl.BlockSpec((1, 1), lambda i: (i, 0),
                                   memory_space=pltpu.MemorySpace.SMEM),
        ),
        compiler_params=pltpu.CompilerParams(
            dimension_semantics=("parallel",),
            vmem_limit_bytes=min(vmem_cap, vmem_budget + 16 * 1024 * 1024),
        ),
    )(p_s, p_w)

    # 'batchmean' divides by the TRUE batch size, exactly once, outside the grid.
    return jnp.sum(partials) / jnp.float32(B)


def _reference(p_s, p_w):
    lps = jax.nn.log_softmax(p_s.astype(jnp.float32), axis=1)
    lpw = jax.nn.log_softmax(p_w.astype(jnp.float32), axis=1)
    B = p_s.shape[0]
    kl_sw = jnp.sum(jnp.exp(lpw) * (lpw - lps)) / B
    kl_ws = jnp.sum(jnp.exp(lps) * (lps - lpw)) / B
    return kl_sw + kl_ws


if __name__ == "__main__":
    key = jax.random.PRNGKey(0)
    k1, k2, k3, k4 = jax.random.split(key, 4)

    fn = jax.jit(symmetric_kl)

    # Case 1: tiny f32 demo; B=6 exercises the ragged-tile in-kernel masking.
    B1, C1 = 6, 128
    ps1 = jax.random.normal(k1, (B1, C1), dtype=jnp.float32)  # student logits
    pw1 = jax.random.normal(k2, (B1, C1), dtype=jnp.float32)  # weak/teacher logits
    loss1 = jax.block_until_ready(fn(ps1, pw1))
    ref1 = _reference(ps1, pw1)
    assert jnp.allclose(loss1, ref1, rtol=5e-4, atol=1e-5), (loss1, ref1)

    # Case 2: bf16 logits, multi-tile grid + ragged last tile.
    B2, C2 = 40, 256
    ps2 = jax.random.normal(k3, (B2, C2), dtype=jnp.bfloat16)
    pw2 = jax.random.normal(k4, (B2, C2), dtype=jnp.bfloat16)
    loss2 = jax.block_until_ready(fn(ps2, pw2))
    ref2 = _reference(ps2, pw2)
    assert jnp.allclose(loss2, ref2, rtol=5e-4, atol=1e-5), (loss2, ref2)

    print("KERNEL_OK")
</pallas_src>

<mosaic_0001>
module attributes {stable_mosaic.version = 11 : i64} {
  func.func @kernel(%arg0: i32, %arg1: memref<8x128xf32, #tpu.memory_space<vmem>>, %arg2: memref<8x128xf32, #tpu.memory_space<vmem>>, %arg3: memref<1x1xf32, #tpu.memory_space<smem>>) attributes {dimension_semantics = [#tpu.dimension_semantics<parallel>], iteration_bounds = array<i64: 1>, scalar_prefetch = 0 : i64, scratch_operands = 0 : i64, tpu.core_type = #tpu.core_type<tc>, window_params = [{transform_indices = @transform_0, window_bounds = array<i64: 8, 128>}, {transform_indices = @transform_1, window_bounds = array<i64: 8, 128>}, {transform_indices = @transform_2, window_bounds = array<i64: 1, 1>}]} {
    %c0 = arith.constant 0 : index
    %c0_0 = arith.constant 0 : index
    %0 = vector.load %arg1[%c0, %c0_0] : memref<8x128xf32, #tpu.memory_space<vmem>>, vector<8x128xf32>
    %c0_1 = arith.constant 0 : index
    %c0_2 = arith.constant 0 : index
    %1 = vector.load %arg2[%c0_1, %c0_2] : memref<8x128xf32, #tpu.memory_space<vmem>>, vector<8x128xf32>
    %cst = arith.constant dense<0xFF800000> : vector<8xf32>
    %2 = vector.multi_reduction <maximumf>, %0, %cst [1] : vector<8x128xf32> to vector<8xf32>
    %3 = vector.shape_cast %2 : vector<8xf32> to vector<8x1xf32>
    %4 = vector.broadcast %3 : vector<8x1xf32> to vector<8x128xf32>
    %5 = arith.subf %0, %4 : vector<8x128xf32>
    %cst_3 = arith.constant dense<0xFF800000> : vector<8xf32>
    %6 = vector.multi_reduction <maximumf>, %1, %cst_3 [1] : vector<8x128xf32> to vector<8xf32>
    %7 = vector.shape_cast %6 : vector<8xf32> to vector<8x1xf32>
    %8 = vector.broadcast %7 : vector<8x1xf32> to vector<8x128xf32>
    %9 = arith.subf %1, %8 : vector<8x128xf32>
    %10 = math.exp %5 : vector<8x128xf32>
    %11 = math.exp %9 : vector<8x128xf32>
    %cst_4 = arith.constant dense<0.000000e+00> : vector<8xf32>
    %12 = vector.multi_reduction <add>, %10, %cst_4 [1] : vector<8x128xf32> to vector<8xf32>
    %13 = vector.shape_cast %12 : vector<8xf32> to vector<8x1xf32>
    %cst_5 = arith.constant dense<0.000000e+00> : vector<8xf32>
    %14 = vector.multi_reduction <add>, %11, %cst_5 [1] : vector<8x128xf32> to vector<8xf32>
    %15 = vector.shape_cast %14 : vector<8xf32> to vector<8x1xf32>
    %16 = vector.broadcast %13 : vector<8x1xf32> to vector<8x128xf32>
    %17 = arith.divf %10, %16 : vector<8x128xf32>
    %18 = vector.broadcast %15 : vector<8x1xf32> to vector<8x128xf32>
    %19 = arith.divf %11, %18 : vector<8x128xf32>
    %20 = arith.subf %9, %5 : vector<8x128xf32>
    %21 = arith.divf %13, %15 : vector<8x1xf32>
    %22 = math.log %21 : vector<8x1xf32>
    %23 = vector.broadcast %22 : vector<8x1xf32> to vector<8x128xf32>
    %24 = arith.addf %20, %23 : vector<8x128xf32>
    %25 = arith.subf %19, %17 : vector<8x128xf32>
    %26 = arith.mulf %25, %24 : vector<8x128xf32>
    %c8_i32 = arith.constant 8 : i32
    %27 = arith.muli %arg0, %c8_i32 : i32
    %28 = tpu.iota {dimensions = array<i32: 0>} : vector<8x128xi32>
    %29 = vector.broadcast %27 : i32 to vector<8x128xi32>
    %30 = arith.addi %29, %28 : vector<8x128xi32>
    %c6_i32 = arith.constant 6 : i32
    %31 = vector.broadcast %c6_i32 : i32 to vector<8x128xi32>
    %32 = arith.cmpi slt, %30, %31 : vector<8x128xi32>
    %cst_6 = arith.constant 0.000000e+00 : f32
    %33 = vector.broadcast %cst_6 : f32 to vector<8x128xf32>
    %34 = arith.select %32, %26, %33 : vector<8x128xi1>, vector<8x128xf32>
    %35 = vector.shape_cast %34 : vector<8x128xf32> to vector<1x8x128xf32>
    %cst_7 = arith.constant dense<0.000000e+00> : vector<1xf32>
    %36 = vector.multi_reduction <add>, %35, %cst_7 [1, 2] : vector<1x8x128xf32> to vector<1xf32>
    %37 = vector.shape_cast %36 : vector<1xf32> to vector<1x1x1xf32>
    %38 = vector.extract %37[0, 0, 0] : f32 from vector<1x1x1xf32>
    %c0_8 = arith.constant 0 : index
    %c0_9 = arith.constant 0 : index
    %39 = memref.load %arg3[%c0_8, %c0_9] : memref<1x1xf32, #tpu.memory_space<smem>>
    memref.store %38, %arg3[%c0_8, %c0_9] : memref<1x1xf32, #tpu.memory_space<smem>>
    return
  }
  func.func @transform_0(%arg0: i32) -> (i32, i32) {
    %c0_i32 = arith.constant 0 : i32
    %c0_i32_0 = arith.constant 0 : i32
    return %arg0, %c0_i32 : i32, i32
  }
  func.func @transform_1(%arg0: i32) -> (i32, i32) {
    %c0_i32 = arith.constant 0 : i32
    %c0_i32_0 = arith.constant 0 : i32
    return %arg0, %c0_i32 : i32, i32
  }
  func.func @transform_2(%arg0: i32) -> (i32, i32) {
    %c0_i32 = arith.constant 0 : i32
    %c0_i32_0 = arith.constant 0 : i32
    return %arg0, %c0_i32 : i32, i32
  }
}

</mosaic_0001>

<bundles_post_ra>
// kernel: symmetric_kl.1
= control target key start
LH: loop header
LB: loop body
LE: loop exit
PB: predicated region body
PF: predicated region fallthrough
CT: control target
= control target key end

     0   :  { %7 = vsyncpa [#allocation3], 0  ;;  %s225_s0 = inlined_call_operand.hbm [shape: f32[6,128], index: 0, kind: input, shape index: {}]   ;;  %s226_s1 = inlined_call_operand.hbm [shape: f32[6,128], index: 1, kind: input, shape index: {}]   ;;  %s227_s2 = inlined_call_operand.hbm [shape: f32[1,1], index: 2, kind: output, shape index: {}]  }
   0x1   :  { %8 = vsyncpa [#allocation6], 0 }
   0x2   :  { %9 = vsyncpa [#allocation4], 0  ;;  %s171_s9 = smov [#allocation2]   ;;  %s172_s11 = smov [#allocation5]  }
   0x3   :  { %s16_s10 = sshll.u32 %s171_s9, 4  ;;  %s26_s12 = sshll.u32 %s172_s11, 4  ;;  %s17_s10 = int_to_ptr.vmem [resolvable:$true] %s16_s10  ;;  %s27_s12 = int_to_ptr.vmem [resolvable:$true] %s26_s12 }
   0x4   :  { %s111_s15 = scalar_lea.hbm %s225_s0, 128 }
   0x5   :  { %p112_p0 = scmp.ne.s32.totalorder %s225_s0, %s111_s15  ;;  %p115_p1 = scmp.lt.u32.totalorder %s111_s15, %s225_s0 }
   0x7   :  { %p117_p2 = pnand %p115_p1, %p112_p0 }
   0x9   :  { %120 = shalt.err (!%p117_p2)
}
   0xa   :  { %s121_s20 = scalar_lea.vmem %s17_s10, 128  ;;  %p126_p4 = scmp.lt.s32.totalorder %s17_s10, %s17_s10 }
   0xb   :  { %p122_p3 = scmp.ne.s32.totalorder %s17_s10, %s121_s20  ;;  %p127_p5 = scmp.lt.s32.totalorder %s121_s20, %s121_s20 }
   0xd   :  { %p128_p6 = por %p127_p5, %p126_p4 }
   0xf   :  { %p129_p7 = pnand %p128_p6, %p122_p3 }
  0x11   :  { %132 = shalt.err (!%p129_p7)
}
  0x12   :  { %19 = dma.hbm_to_vmem [thread:$0]  %s225_s0, 128, %s17_s10, [#allocation3]  }
  0x13   :  { %s133_s25 = scalar_lea.hbm %s226_s1, 128 }
  0x14   :  { %p134_p8 = scmp.ne.s32.totalorder %s226_s1, %s133_s25  ;;  %p137_p9 = scmp.lt.u32.totalorder %s133_s25, %s226_s1 }
  0x16   :  { %p139_p10 = pnand %p137_p9, %p134_p8 }
  0x18   :  { %142 = shalt.err (!%p139_p10)
}
  0x19   :  { %s143_s30 = scalar_lea.vmem %s27_s12, 128  ;;  %p148_p12 = scmp.lt.s32.totalorder %s27_s12, %s27_s12 }
  0x1a   :  { %p144_p11 = scmp.ne.s32.totalorder %s27_s12, %s143_s30  ;;  %p149_p13 = scmp.lt.s32.totalorder %s143_s30, %s143_s30 }
  0x1c   :  { %p150_p0 = por %p149_p13, %p148_p12 }
  0x1e   :  { %p151_p1 = pnand %p150_p0, %p144_p11 }
  0x20   :  { %154 = shalt.err (!%p151_p1)
}
  0x21   :  { %29 = dma.hbm_to_vmem [thread:$0]  %s226_s1, 128, %s27_s12, [#allocation6]  }
  0x22   :  { %165 = dma.done.wait [#allocation3], 128  }
  0x23   :  { %166 = vsyncadd [#allocation3], 4294967168 }
  0x24   :  { %167 = dma.done.wait [#allocation6], 128  }
  0x25   :  { %168 = vsyncadd [#allocation6], 4294967168  ;;  %v37_v0 = vld [vmem:[#allocation5] sm:$0xff]  ;;  %v36_v1 = vld [vmem:[#allocation2] sm:$0xff]  ;;  %v64_v16 = vlaneseq  ;;  %s155_s6 = scalar_lea.hbm %s227_s2, 16 }
  0x26   :  { %41 = vmax.xlane.f32.xlu0 %v37_v0  ;;  %p156_p2 = scmp.ne.s32.totalorder %s227_s2, %s155_s6  ;;  %p159_p3 = scmp.lt.u32.totalorder %s155_s6, %s227_s2 }
  0x27   :  { %v65_v19 = vshrl.u32 %v64_v16, 7 }
  0x28   :  { %p161_p4 = pnand %p159_p3, %p156_p2 }
  0x29   :  { %vm68_vm0 = vcmp.lt.s32.totalorder %v65_v19, 6 }
  0x2a   :  { %38 = vmax.xlane.f32.xlu0 %v36_v1 }
  0xb3   :  { %v42_v2 = vpop.xlane.xlu0 %41 }
  0xb4   :  { %v43_v3 = vsub.f32 %v37_v0, %v42_v2 }
  0xb6   :  { %v46_v4 = vmul.f32 1.442695, %v43_v3 }
  0xb7   :  { %v39_v5 = vpop.xlane.xlu0 %38 }
  0xb8   :  { %101 = vpow2.f32 %v46_v4  ;;  %v40_v6 = vsub.f32 %v36_v1, %v39_v5 }
  0xba   :  { %v44_v7 = vmul.f32 1.442695, %v40_v6  ;;  %v56_v8 = vsub.f32 %v43_v3, %v40_v6 }
  0xbc   :  { %103 = vpow2.f32 %v44_v7 }
  0xc2   :  { %v102_v9 = vpop.eup %101 }
  0xc3   :  { %50 = vadd.xlane.f32.xlu1 %v102_v9 }
  0xc6   :  { %v104_v10 = vpop.eup %103 }
  0xc7   :  { %48 = vadd.xlane.f32.xlu1 %v104_v10 }
 0x150   :  { %v51_v11 = vpop.xlane.xlu1 %50 }
 0x151   :  { %105 = vrcp.f32 %v51_v11 }
 0x154   :  { %v49_v12 = vpop.xlane.xlu1 %48 }
 0x155   :  { %107 = vrcp.f32 %v49_v12 }
 0x15b   :  { %v106_v13 = vpop.eup %105 }
 0x15c   :  { %v57_v14 = vmul.f32 %v106_v13, %v49_v12  ;;  %v55_v21 = vmul.f32 %v106_v13, %v102_v9 }
 0x15e   :  { %109 = vlog2.f32 %v57_v14 }
 0x15f   :  { %v108_v15 = vpop.eup %107 }
 0x160   :  { %v53_v17 = vmul.f32 %v108_v15, %v104_v10 }
 0x162   :  { %v61_v23 = vsub.f32 %v55_v21, %v53_v17 }
 0x168   :  { %v110_v18 = vpop.eup %109 }
 0x169   :  { %v59_v20 = vmul.f32 0.6931472, %v110_v18 }
 0x16b   :  { %v60_v22 = vadd.f32 %v59_v20, %v56_v8 }
 0x16d   :  { %v62_v24 = vmul.f32 %v61_v23, %v60_v22 }
 0x16f   :  { %v69_v25 = vsel %vm68_vm0, %v62_v24, 0.0 }
 0x170   :  { %70 = vadd.xlane.f32.xlu0 %v69_v25 }
 0x1fd   :  { %v71_v26 = vpop.xlane.xlu0 %70 }
 0x1fe   :  { %v72_v27 = vrot.slane %v71_v26, 4 }
 0x200   :  { %v73_v28 = vadd.f32 %v72_v27, %v71_v26 }
 0x202   :  { %v74_v29 = vrot.slane %v73_v28, 2 }
 0x204   :  { %v75_v30 = vadd.f32 %v74_v29, %v73_v28 }
 0x206   :  { %v76_v31 = vrot.slane %v75_v30, 1 }
 0x208   :  { %v77_v32 = vadd.f32 %v76_v31, %v75_v30 }
 0x20a   :  { %96 = vpush %v77_v32 }
 0x23b   :  { %s97_s1 = spop %96 }
 0x23c   :  { %80 = sst [smem:[#allocation7]] %s97_s1 }
 0x23d   :  { %164 = shalt.err (!%p161_p4)
}
 0x23e   :  { %s173_s11 = smov [#allocation7]  }
 0x23f   :  { %88 = dma.smem_to_hbm %s173_s11, 16, %s227_s2, [#allocation4]  }
 0x240   :  { %169 = dma.done.wait [#allocation4], 16  }
 0x241   :  { %170 = vsyncadd [#allocation4], 4294967280 }
 0x242   :  { %92 = sfence }
 0x243   :  { %93 = vsyncpa [#allocation3], 1 }
 0x244   :  { %94 = vsyncpa [#allocation6], 1 }
 0x245   :  { %95 = vsyncpa [#allocation4], 1 }

</bundles_post_ra>
